<compile_context>
chip_gen: v6e
topology: v6e:2x2x1
jax: 0.10.0
libtpu: 0.0.40
codegen_flags: <defaults>
</compile_context>

<pallas_src>
import functools

import jax
import jax.numpy as jnp
import numpy as np
from jax.experimental import pallas as pl
from jax.experimental.pallas import tpu as pltpu

_EPS = 1e-8


def _cluster_mask(m, tile_n, tile_idx, d):
    """Boolean mask[c, j] = (global sample tile_idx*tile_n + j) is in cluster c.

    Uses boundary comparisons (no integer division); tiles may straddle
    cluster boundaries."""
    col = tile_idx * tile_n + jax.lax.broadcasted_iota(jnp.int32, (m, tile_n), 1)
    lo = jax.lax.broadcasted_iota(jnp.int32, (m, tile_n), 0) * d
    return jnp.logical_and(col >= lo, col < lo + d)


def _magnet_loss_kernel(r_ref, classes_ref, ccls_ref,            # inputs
                        total_ref, losses_ref,                   # outputs
                        means_ref, munorm_ref, rnorm_ref, acc_ref,  # scratch
                        *maybe_rcache,                           # optional r cache
                        alpha, d, n_total, tile_n):
    rcache_ref = maybe_rcache[0] if maybe_rcache else None
    phase = pl.program_id(0)
    t = pl.program_id(1)
    m = means_ref.shape[0]

    @pl.when(jnp.logical_and(phase == 0, t == 0))
    def _init():
        means_ref[...] = jnp.zeros_like(means_ref)
        losses_ref[...] = jnp.zeros_like(losses_ref)   # keep block initialized
        acc_ref[0] = 0.0        # variance numerator accumulator
        acc_ref[1] = 0.0        # running sum of per-sample losses

    @pl.when(phase == 0)
    def _phase0():
        r = r_ref[...]                                           # (TN, D)
        if rcache_ref is not None:
            rcache_ref[t] = r                                    # VMEM residency
        # Per-sample squared norms, produced lane-dense: ones(1,D) @ (r*r)^T.
        rsq = r * r
        rnorm_row = jax.lax.dot_general(
            jnp.ones((1, r.shape[1]), jnp.float32), rsq,
            dimension_numbers=(((1,), (1,)), ((), ())),
            preferred_element_type=jnp.float32)                  # (1, TN)
        rnorm_ref[t] = rnorm_row
        # Partial cluster means: mask @ r on the MXU.  Tiles need not be
        # cluster-aligned; partial clusters contribute partial sums.
        mask = _cluster_mask(m, tile_n, t, d).astype(jnp.float32)
        means_ref[...] = means_ref[...] + jnp.dot(
            mask, r, preferred_element_type=jnp.float32) * (1.0 / d)
        acc_ref[0] = acc_ref[0] + jnp.sum(rnorm_row)

    @pl.when(phase == 1)
    def _phase1():
        means = means_ref[...]                                   # (m, D)

        @pl.when(t == 0)
        def _finalize_stats():
            # Means are final here; compute ||mu_c||^2 once and finish the
            # variance numerator: sum_i ||r_i - mu_c(i)||^2
            #                   = sum_i ||r_i||^2 - d * sum_c ||mu_c||^2.
            munorm_ref[...] = jnp.sum(means * means, axis=1, keepdims=True)
            acc_ref[0] = acc_ref[0] - float(d) * jnp.sum(munorm_ref[...])

        if rcache_ref is not None:
            r = rcache_ref[t]                                    # VMEM, no HBM re-read
        else:
            r = r_ref[...]                                       # (TN, D) from HBM

        # Squared distances in (m, TN) orientation (MXU matmul).
        cross = jax.lax.dot_general(
            means, r, dimension_numbers=(((1,), (1,)), ((), ())),
            preferred_element_type=jnp.float32)                  # (m, TN)
        rnorm_row = rnorm_ref[t]                                 # (1, TN)
        munorm_col = munorm_ref[...]                             # (m, 1)
        costs = jnp.maximum(munorm_col + rnorm_row - 2.0 * cross, 0.0)

        variance = acc_ref[0] * (1.0 / float(n_total - 1))
        var_norm = -1.0 / (2.0 * variance * variance)

        mask = _cluster_mask(m, tile_n, t, d)                    # bool (m, TN)
        intra_row = jnp.sum(jnp.where(mask, costs, 0.0), axis=0, keepdims=True)

        numerator = jnp.exp(var_norm * intra_row - alpha)        # (1, TN)
        same_class = classes_ref[...] == ccls_ref[...]           # (m, TN) bool
        denominator = jnp.sum(
            jnp.where(same_class, 0.0, jnp.exp(var_norm * costs)),
            axis=0, keepdims=True)                               # (1, TN)

        losses = jnp.maximum(
            -jnp.log(numerator / (denominator + _EPS) + _EPS), 0.0)
        losses_ref[...] = losses                                 # lane-dense block
        acc_ref[1] = acc_ref[1] + jnp.sum(losses)

        @pl.when(t == pl.num_programs(1) - 1)
        def _final():
            total_ref[0] = acc_ref[1] * (1.0 / n_total)


def _vmem_capacity_bytes():
    """Per-chip VMEM capacity (conservative fallback if the query fails)."""
    try:
        info = pltpu.get_tpu_info()
        cap = getattr(info, "vmem_capacity_bytes", None)
        if cap:
            return int(cap)
    except Exception:
        pass
    return 64 * 2**20          # safe on every generation (v7x = 64 MiB)


def _pick_tile_n(n, feat, m, vmem_cap):
    """Largest tile dividing N that is 128-aligned and fits the per-generation
    working-set budget (r block double-buffered + ~8 (m, tile) intermediates)."""
    target = (4 << 20) if vmem_cap >= (100 << 20) else (2 << 20)
    per_row = 2 * feat * 4 + 8 * m * 4
    if n * per_row <= target:
        return n
    best = None
    for tn in range(128, n, 128):
        if n % tn == 0 and tn * per_row <= target:
            best = tn
    return best if best is not None else n


def magnet_loss(r, classes, m, d, alpha=1.0, tile_n=None):
    """JAX/Pallas equivalent of MagnetLoss.forward(r, classes, m, d, alpha)."""
    r = jnp.asarray(r, dtype=jnp.float32)
    n, feat = r.shape
    assert n == m * d, "batch must be m clusters of d examples"

    classes = jnp.asarray(classes, dtype=jnp.int32).reshape(n)
    classes_row = classes.reshape(1, n)                       # int32, lane-dense
    ccls_col = classes[0:m * d:d].reshape(m, 1)               # int32, per cluster

    vmem_cap = _vmem_capacity_bytes()
    if tile_n is None:
        tile_n = _pick_tile_n(n, feat, m, vmem_cap)
    assert n % tile_n == 0
    assert tile_n == n or tile_n % 128 == 0
    n_tiles = n // tile_n

    # Cache r in VMEM across the two phases when it fits a quarter of VMEM
    # (avoids the second HBM read of r; pointless when there is one tile).
    use_rcache = (n_tiles > 1) and (n * feat * 4 <= vmem_cap // 4)

    if use_rcache:
        # Phase 1 pins the HBM block index to the last tile -> no re-fetch.
        r_map = lambda p, t: (t * (1 - p) + p * (n_tiles - 1), 0)
    else:
        r_map = lambda p, t: (t, 0)

    kernel = functools.partial(_magnet_loss_kernel, alpha=float(alpha),
                               d=int(d), n_total=int(n), tile_n=int(tile_n))

    scratch = [
        pltpu.VMEM((m, feat), jnp.float32),                   # cluster means
        pltpu.VMEM((m, 1), jnp.float32),                      # ||mu_c||^2
        pltpu.VMEM((n_tiles, 1, tile_n), jnp.float32),        # per-sample ||r||^2
        pltpu.SMEM((2,), jnp.float32),                        # [var numerator, loss sum]
    ]
    if use_rcache:
        scratch.append(pltpu.VMEM((n_tiles, tile_n, feat), jnp.float32))

    # VMEM estimate and per-generation scoped-limit cap (v7x: 64 MiB physical).
    est = (2 * tile_n * feat * 4
           + (n_tiles * tile_n * feat * 4 if use_rcache else 0)
           + m * feat * 4
           + n_tiles * tile_n * 4 + 2 * n * 4 + m * 4
           + 8 * m * tile_n * 4)
    vmem_limit = int(min(max(2 * est, 32 << 20), (vmem_cap * 3) // 4))

    total, losses = pl.pallas_call(
        kernel,
        grid=(2, n_tiles),                                    # phase major, tile minor
        in_specs=[
            pl.BlockSpec((tile_n, feat), r_map),
            pl.BlockSpec((1, tile_n), lambda p, t: (0, t * p)),
            pl.BlockSpec((m, 1), lambda p, t: (0, 0)),
        ],
        out_specs=[
            pl.BlockSpec(memory_space=pltpu.MemorySpace.SMEM),
            pl.BlockSpec((1, tile_n), lambda p, t: (0, t * p)),
        ],
        out_shape=[
            jax.ShapeDtypeStruct((1,), jnp.float32),
            jax.ShapeDtypeStruct((1, n), jnp.float32),
        ],
        scratch_shapes=scratch,
        compiler_params=pltpu.CompilerParams(
            dimension_semantics=("arbitrary", "arbitrary"),
            vmem_limit_bytes=vmem_limit),
    )(r, classes_row, ccls_col)

    return total[0], losses[0]


def _magnet_loss_ref(r, classes, m, d, alpha=1.0):
    """Pure-JAX reference mirroring the PyTorch module."""
    r = jnp.asarray(r, dtype=jnp.float32)
    n = r.shape[0]
    classes = jnp.asarray(classes, dtype=jnp.int32)
    clusters = jnp.repeat(jnp.arange(m), d)
    cluster_classes = classes[0:m * d:d]
    cluster_means = jnp.stack([jnp.mean(c, axis=0) for c in jnp.split(r, m)])
    sample_costs = jnp.sum((cluster_means[None, :, :] - r[:, None, :]) ** 2, axis=2)
    intra_mask = (clusters[:, None] == jnp.arange(m)[None, :]).astype(jnp.float32)
    intra_costs = jnp.sum(intra_mask * sample_costs, axis=1)
    variance = jnp.sum(intra_costs) / float(n - 1)
    var_norm = -1.0 / (2.0 * variance ** 2)
    numerator = jnp.exp(var_norm * intra_costs - alpha)
    diff_mask = 1.0 - (classes[:, None] == cluster_classes[None, :]).astype(jnp.float32)
    denominator = jnp.sum(diff_mask * jnp.exp(var_norm * sample_costs), axis=1)
    losses = jnp.maximum(-jnp.log(numerator / (denominator + _EPS) + _EPS), 0.0)
    return jnp.mean(losses), losses


def _check(total, losses, ref_total, ref_losses):
    np.testing.assert_allclose(np.asarray(total), np.asarray(ref_total),
                               rtol=2e-3, atol=1e-3)
    np.testing.assert_allclose(np.asarray(losses), np.asarray(ref_losses),
                               rtol=2e-3, atol=1e-3)


if __name__ == "__main__":
    key = jax.random.PRNGKey(0)

    # 1) Small, module-consistent shapes: m clusters of d samples, D-dim feats.
    m1, d1, feat1 = 4, 4, 32
    n1 = m1 * d1
    r1 = jax.random.normal(key, (n1, feat1), dtype=jnp.float32)
    classes1 = np.repeat(np.array([0, 0, 1, 1], dtype=np.int64), d1)
    total1, losses1 = magnet_loss(r1, classes1, m1, d1, alpha=1.0)
    jax.block_until_ready((total1, losses1))
    _check(total1, losses1, *_magnet_loss_ref(r1, classes1, m1, d1, alpha=1.0)[::-1][::-1])
    ref_t1, ref_l1 = _magnet_loss_ref(r1, classes1, m1, d1, alpha=1.0)
    _check(total1, losses1, ref_t1, ref_l1)

    # 2) Tiled, two-phase path with the VMEM r-cache (cluster-aligned tiles).
    m2, d2, feat2 = 4, 64, 128
    n2 = m2 * d2
    r2 = jax.random.normal(jax.random.PRNGKey(1), (n2, feat2), dtype=jnp.float32)
    classes2 = np.repeat(np.array([0, 1, 0, 1], dtype=np.int64), d2)
    total2, losses2 = magnet_loss(r2, classes2, m2, d2, alpha=1.0, tile_n=128)
    jax.block_until_ready((total2, losses2))
    ref_t2, ref_l2 = _magnet_loss_ref(r2, classes2, m2, d2, alpha=1.0)
    _check(total2, losses2, ref_t2, ref_l2)

    # 3) Tiles that straddle cluster boundaries (tile_n not a multiple of d).
    m3, d3, feat3 = 2, 192, 64
    n3 = m3 * d3
    r3 = jax.random.normal(jax.random.PRNGKey(2), (n3, feat3), dtype=jnp.float32)
    classes3 = np.repeat(np.array([0, 1], dtype=np.int64), d3)
    total3, losses3 = magnet_loss(r3, classes3, m3, d3, alpha=1.0, tile_n=128)
    jax.block_until_ready((total3, losses3))
    ref_t3, ref_l3 = _magnet_loss_ref(r3, classes3, m3, d3, alpha=1.0)
    _check(total3, losses3, ref_t3, ref_l3)

    print("KERNEL_OK")
</pallas_src>

<mosaic_0001>
module attributes {stable_mosaic.version = 11 : i64} {
  func.func @_magnet_loss_kernel(%arg0: i32, %arg1: i32, %arg2: memref<16x32xf32, #tpu.memory_space<vmem>>, %arg3: memref<1x16xi32, #tpu.memory_space<vmem>>, %arg4: memref<4x1xi32, #tpu.memory_space<vmem>>, %arg5: memref<1xf32, #tpu.memory_space<smem>>, %arg6: memref<1x16xf32, #tpu.memory_space<vmem>>, %arg7: memref<4x32xf32, #tpu.memory_space<vmem>>, %arg8: memref<4x1xf32, #tpu.memory_space<vmem>>, %arg9: memref<1x1x16xf32, #tpu.memory_space<vmem>>, %arg10: memref<2xf32, #tpu.memory_space<smem>>) attributes {dimension_semantics = [#tpu.dimension_semantics<arbitrary>, #tpu.dimension_semantics<arbitrary>], iteration_bounds = array<i64: 2, 1>, scalar_prefetch = 0 : i64, scratch_operands = 4 : i64, tpu.core_type = #tpu.core_type<tc>, window_params = [{transform_indices = @transform_0, window_bounds = array<i64: 16, 32>}, {transform_indices = @transform_1, window_bounds = array<i64: 1, 16>}, {pipeline_mode = #tpu.pipeline_mode<synchronous>, transform_indices = @transform_2, window_bounds = array<i64: 4, 1>}, {transform_indices = @transform_3, window_bounds = array<i64: 1>}, {transform_indices = @transform_4, window_bounds = array<i64: 1, 16>}]} {
    %c0_i32 = arith.constant 0 : i32
    %0 = arith.cmpi eq, %arg0, %c0_i32 : i32
    %c0_i32_0 = arith.constant 0 : i32
    %1 = arith.cmpi eq, %arg1, %c0_i32_0 : i32
    %2 = arith.andi %0, %1 : i1
    %3 = arith.extui %2 : i1 to i32
    %c0_i32_1 = arith.constant 0 : i32
    %4 = arith.cmpi ne, %3, %c0_i32_1 : i32
    scf.if %4 {
      %cst = arith.constant 0.000000e+00 : f32
      %11 = vector.broadcast %cst : f32 to vector<4x32xf32>
      %c0 = arith.constant 0 : index
      %c0_5 = arith.constant 0 : index
      %12 = vector.load %arg7[%c0, %c0_5] : memref<4x32xf32, #tpu.memory_space<vmem>>, vector<4x32xf32>
      tpu.vector_store %arg7[%c0, %c0_5], %11 {strides = array<i32>} : memref<4x32xf32, #tpu.memory_space<vmem>>, vector<4x32xf32>,
      %cst_6 = arith.constant 0.000000e+00 : f32
      %13 = vector.broadcast %cst_6 : f32 to vector<1x16xf32>
      %c0_7 = arith.constant 0 : index
      %c0_8 = arith.constant 0 : index
      %14 = vector.load %arg6[%c0_7, %c0_8] : memref<1x16xf32, #tpu.memory_space<vmem>>, vector<1x16xf32>
      tpu.vector_store %arg6[%c0_7, %c0_8], %13 {strides = array<i32>} : memref<1x16xf32, #tpu.memory_space<vmem>>, vector<1x16xf32>,
      %cst_9 = arith.constant 0.000000e+00 : f32
      %c0_10 = arith.constant 0 : index
      %15 = memref.load %arg10[%c0_10] : memref<2xf32, #tpu.memory_space<smem>>
      memref.store %cst_9, %arg10[%c0_10] : memref<2xf32, #tpu.memory_space<smem>>
      %cst_11 = arith.constant 0.000000e+00 : f32
      %c1 = arith.constant 1 : index
      %16 = memref.load %arg10[%c1] : memref<2xf32, #tpu.memory_space<smem>>
      memref.store %cst_11, %arg10[%c1] : memref<2xf32, #tpu.memory_space<smem>>
    } else {
    }
    %c0_i32_2 = arith.constant 0 : i32
    %5 = arith.cmpi eq, %arg0, %c0_i32_2 : i32
    %6 = arith.extui %5 : i1 to i32
    %c0_i32_3 = arith.constant 0 : i32
    %7 = arith.cmpi ne, %6, %c0_i32_3 : i32
    scf.if %7 {
      %c0 = arith.constant 0 : index
      %c0_5 = arith.constant 0 : index
      %11 = vector.load %arg2[%c0, %c0_5] : memref<16x32xf32, #tpu.memory_space<vmem>>, vector<16x32xf32>
      %12 = arith.mulf %11, %11 : vector<16x32xf32>
      %cst = arith.constant 1.000000e+00 : f32
      %13 = vector.broadcast %cst : f32 to vector<1x32xf32>
      %cst_6 = arith.constant dense<0.000000e+00> : vector<1x16xf32>
      %14 = tpu.matmul %13, %12, %cst_6 {dimension_numbers = #tpu.dot_dimension_numbers<[1], [1], [0], [0], [0, 0, 1, 0], [], []>} : vector<1x32xf32>, vector<16x32xf32>, vector<1x16xf32> -> vector<1x16xf32>
      %15 = arith.index_cast %arg1 : i32 to index
      %c0_7 = arith.constant 0 : index
      %c0_8 = arith.constant 0 : index
      %16 = vector.load %arg9[%15, %c0_7, %c0_8] : memref<1x1x16xf32, #tpu.memory_space<vmem>>, vector<1x1x16xf32>
      %17 = vector.shape_cast %16 : vector<1x1x16xf32> to vector<1x16xf32>
      %18 = vector.shape_cast %14 : vector<1x16xf32> to vector<1x1x16xf32>
      tpu.vector_store %arg9[%15, %c0_7, %c0_8], %18 {strides = array<i32>} : memref<1x1x16xf32, #tpu.memory_space<vmem>>, vector<1x1x16xf32>,
      %c16_i32 = arith.constant 16 : i32
      %19 = arith.muli %arg1, %c16_i32 : i32
      %20 = tpu.iota {dimensions = array<i32: 1>} : vector<4x16xi32>
      %21 = vector.broadcast %19 : i32 to vector<4x16xi32>
      %22 = arith.addi %21, %20 : vector<4x16xi32>
      %23 = tpu.iota {dimensions = array<i32: 0>} : vector<4x16xi32>
      %c4_i32 = arith.constant 4 : i32
      %24 = vector.broadcast %c4_i32 : i32 to vector<4x16xi32>
      %25 = arith.muli %23, %24 : vector<4x16xi32>
      %26 = arith.cmpi sge, %22, %25 : vector<4x16xi32>
      %c4_i32_9 = arith.constant 4 : i32
      %27 = vector.broadcast %c4_i32_9 : i32 to vector<4x16xi32>
      %28 = arith.addi %25, %27 : vector<4x16xi32>
      %29 = arith.cmpi slt, %22, %28 : vector<4x16xi32>
      %30 = arith.andi %26, %29 : vector<4x16xi1>
      %31 = arith.extui %30 : vector<4x16xi1> to vector<4x16xi32>
      %32 = arith.sitofp %31 : vector<4x16xi32> to vector<4x16xf32>
      %c0_10 = arith.constant 0 : index
      %c0_11 = arith.constant 0 : index
      %33 = vector.load %arg7[%c0_10, %c0_11] : memref<4x32xf32, #tpu.memory_space<vmem>>, vector<4x32xf32>
      %cst_12 = arith.constant dense<0.000000e+00> : vector<4x32xf32>
      %34 = tpu.matmul %32, %11, %cst_12 {dimension_numbers = #tpu.dot_dimension_numbers<[1], [0], [0], [1], [0, 0, 1, 1], [], []>} : vector<4x16xf32>, vector<16x32xf32>, vector<4x32xf32> -> vector<4x32xf32>
      %cst_13 = arith.constant 2.500000e-01 : f32
      %35 = vector.broadcast %cst_13 : f32 to vector<4x32xf32>
      %36 = arith.mulf %34, %35 : vector<4x32xf32>
      %37 = arith.addf %33, %36 : vector<4x32xf32>
      %c0_14 = arith.constant 0 : index
      %c0_15 = arith.constant 0 : index
      %38 = vector.load %arg7[%c0_14, %c0_15] : memref<4x32xf32, #tpu.memory_space<vmem>>, vector<4x32xf32>
      tpu.vector_store %arg7[%c0_14, %c0_15], %37 {strides = array<i32>} : memref<4x32xf32, #tpu.memory_space<vmem>>, vector<4x32xf32>,
      %c0_16 = arith.constant 0 : index
      %39 = memref.load %arg10[%c0_16] : memref<2xf32, #tpu.memory_space<smem>>
      %40 = vector.shape_cast %14 : vector<1x16xf32> to vector<1x1x16xf32>
      %cst_17 = arith.constant dense<0.000000e+00> : vector<1xf32>
      %41 = vector.multi_reduction <add>, %40, %cst_17 [1, 2] : vector<1x1x16xf32> to vector<1xf32>
      %42 = vector.shape_cast %41 : vector<1xf32> to vector<1x1x1xf32>
      %43 = vector.extract %42[0, 0, 0] : f32 from vector<1x1x1xf32>
      %44 = arith.addf %39, %43 : f32
      %c0_18 = arith.constant 0 : index
      %45 = memref.load %arg10[%c0_18] : memref<2xf32, #tpu.memory_space<smem>>
      memref.store %44, %arg10[%c0_18] : memref<2xf32, #tpu.memory_space<smem>>
    } else {
    }
    %c1_i32 = arith.constant 1 : i32
    %8 = arith.cmpi eq, %arg0, %c1_i32 : i32
    %9 = arith.extui %8 : i1 to i32
    %c0_i32_4 = arith.constant 0 : i32
    %10 = arith.cmpi ne, %9, %c0_i32_4 : i32
    scf.if %10 {
      %c0 = arith.constant 0 : index
      %c0_5 = arith.constant 0 : index
      %11 = vector.load %arg7[%c0, %c0_5] : memref<4x32xf32, #tpu.memory_space<vmem>>, vector<4x32xf32>
      %c0_i32_6 = arith.constant 0 : i32
      %12 = arith.cmpi eq, %arg1, %c0_i32_6 : i32
      %13 = arith.extui %12 : i1 to i32
      %c0_i32_7 = arith.constant 0 : i32
      %14 = arith.cmpi ne, %13, %c0_i32_7 : i32
      scf.if %14 {
        %88 = arith.mulf %11, %11 : vector<4x32xf32>
        %cst_40 = arith.constant dense<0.000000e+00> : vector<4xf32>
        %89 = vector.multi_reduction <add>, %88, %cst_40 [1] : vector<4x32xf32> to vector<4xf32>
        %90 = vector.shape_cast %89 : vector<4xf32> to vector<4x1xf32>
        %c0_41 = arith.constant 0 : index
        %c0_42 = arith.constant 0 : index
        %91 = vector.load %arg8[%c0_41, %c0_42] : memref<4x1xf32, #tpu.memory_space<vmem>>, vector<4x1xf32>
        tpu.vector_store %arg8[%c0_41, %c0_42], %90 {strides = array<i32>} : memref<4x1xf32, #tpu.memory_space<vmem>>, vector<4x1xf32>,
        %c0_43 = arith.constant 0 : index
        %92 = memref.load %arg10[%c0_43] : memref<2xf32, #tpu.memory_space<smem>>
        %c0_44 = arith.constant 0 : index
        %c0_45 = arith.constant 0 : index
        %93 = vector.load %arg8[%c0_44, %c0_45] : memref<4x1xf32, #tpu.memory_space<vmem>>, vector<4x1xf32>
        %94 = vector.shape_cast %93 : vector<4x1xf32> to vector<1x4x1xf32>
        %cst_46 = arith.constant dense<0.000000e+00> : vector<1xf32>
        %95 = vector.multi_reduction <add>, %94, %cst_46 [1, 2] : vector<1x4x1xf32> to vector<1xf32>
        %96 = vector.shape_cast %95 : vector<1xf32> to vector<1x1x1xf32>
        %97 = vector.extract %96[0, 0, 0] : f32 from vector<1x1x1xf32>
        %cst_47 = arith.constant 4.000000e+00 : f32
        %98 = arith.mulf %cst_47, %97 : f32
        %99 = arith.subf %92, %98 : f32
        %c0_48 = arith.constant 0 : index
        %100 = memref.load %arg10[%c0_48] : memref<2xf32, #tpu.memory_space<smem>>
        memref.store %99, %arg10[%c0_48] : memref<2xf32, #tpu.memory_space<smem>>
      } else {
      }
      %c0_8 = arith.constant 0 : index
      %c0_9 = arith.constant 0 : index
      %15 = vector.load %arg2[%c0_8, %c0_9] : memref<16x32xf32, #tpu.memory_space<vmem>>, vector<16x32xf32>
      %cst = arith.constant dense<0.000000e+00> : vector<4x16xf32>
      %16 = tpu.matmul %11, %15, %cst {dimension_numbers = #tpu.dot_dimension_numbers<[1], [1], [0], [0], [0, 0, 1, 0], [], []>} : vector<4x32xf32>, vector<16x32xf32>, vector<4x16xf32> -> vector<4x16xf32>
      %17 = arith.index_cast %arg1 : i32 to index
      %c0_10 = arith.constant 0 : index
      %c0_11 = arith.constant 0 : index
      %18 = vector.load %arg9[%17, %c0_10, %c0_11] : memref<1x1x16xf32, #tpu.memory_space<vmem>>, vector<1x1x16xf32>
      %19 = vector.shape_cast %18 : vector<1x1x16xf32> to vector<1x16xf32>
      %c0_12 = arith.constant 0 : index
      %c0_13 = arith.constant 0 : index
      %20 = vector.load %arg8[%c0_12, %c0_13] : memref<4x1xf32, #tpu.memory_space<vmem>>, vector<4x1xf32>
      %21 = vector.broadcast %20 : vector<4x1xf32> to vector<4x16xf32>
      %22 = vector.broadcast %19 : vector<1x16xf32> to vector<4x16xf32>
      %23 = arith.addf %21, %22 : vector<4x16xf32>
      %cst_14 = arith.constant 2.000000e+00 : f32
      %24 = vector.broadcast %cst_14 : f32 to vector<4x16xf32>
      %25 = arith.mulf %24, %16 : vector<4x16xf32>
      %26 = arith.subf %23, %25 : vector<4x16xf32>
      %cst_15 = arith.constant 0.000000e+00 : f32
      %27 = vector.broadcast %cst_15 : f32 to vector<4x16xf32>
      %28 = arith.maximumf %26, %27 : vector<4x16xf32>
      %c0_16 = arith.constant 0 : index
      %29 = memref.load %arg10[%c0_16] : memref<2xf32, #tpu.memory_space<smem>>
      %cst_17 = arith.constant 0.0666666701 : f32
      %30 = arith.mulf %29, %cst_17 : f32
      %cst_18 = arith.constant 2.000000e+00 : f32
      %31 = arith.mulf %cst_18, %30 : f32
      %32 = arith.mulf %31, %30 : f32
      %cst_19 = arith.constant -1.000000e+00 : f32
      %33 = arith.divf %cst_19, %32 : f32
      %c16_i32 = arith.constant 16 : i32
      %34 = arith.muli %arg1, %c16_i32 : i32
      %35 = tpu.iota {dimensions = array<i32: 1>} : vector<4x16xi32>
      %36 = vector.broadcast %34 : i32 to vector<4x16xi32>
      %37 = arith.addi %36, %35 : vector<4x16xi32>
      %38 = tpu.iota {dimensions = array<i32: 0>} : vector<4x16xi32>
      %c4_i32 = arith.constant 4 : i32
      %39 = vector.broadcast %c4_i32 : i32 to vector<4x16xi32>
      %40 = arith.muli %38, %39 : vector<4x16xi32>
      %41 = arith.cmpi sge, %37, %40 : vector<4x16xi32>
      %c4_i32_20 = arith.constant 4 : i32
      %42 = vector.broadcast %c4_i32_20 : i32 to vector<4x16xi32>
      %43 = arith.addi %40, %42 : vector<4x16xi32>
      %44 = arith.cmpi slt, %37, %43 : vector<4x16xi32>
      %45 = arith.andi %41, %44 : vector<4x16xi1>
      %cst_21 = arith.constant 0.000000e+00 : f32
      %46 = vector.broadcast %cst_21 : f32 to vector<4x16xf32>
      %47 = arith.select %45, %28, %46 : vector<4x16xi1>, vector<4x16xf32>
      %cst_22 = arith.constant dense<0.000000e+00> : vector<16xf32>
      %48 = vector.multi_reduction <add>, %47, %cst_22 [0] : vector<4x16xf32> to vector<16xf32>
      %49 = vector.shape_cast %48 : vector<16xf32> to vector<1x16xf32>
      %50 = vector.broadcast %33 : f32 to vector<1x16xf32>
      %51 = arith.mulf %50, %49 : vector<1x16xf32>
      %cst_23 = arith.constant 1.000000e+00 : f32
      %52 = vector.broadcast %cst_23 : f32 to vector<1x16xf32>
      %53 = arith.subf %51, %52 : vector<1x16xf32>
      %54 = math.exp %53 : vector<1x16xf32>
      %c0_24 = arith.constant 0 : index
      %c0_25 = arith.constant 0 : index
      %55 = vector.load %arg3[%c0_24, %c0_25] : memref<1x16xi32, #tpu.memory_space<vmem>>, vector<1x16xi32>
      %c0_26 = arith.constant 0 : index
      %c0_27 = arith.constant 0 : index
      %56 = vector.load %arg4[%c0_26, %c0_27] : memref<4x1xi32, #tpu.memory_space<vmem>>, vector<4x1xi32>
      %57 = vector.broadcast %55 : vector<1x16xi32> to vector<4x16xi32>
      %58 = vector.broadcast %56 : vector<4x1xi32> to vector<4x16xi32>
      %59 = arith.cmpi eq, %57, %58 : vector<4x16xi32>
      %60 = vector.broadcast %33 : f32 to vector<4x16xf32>
      %61 = arith.mulf %60, %28 : vector<4x16xf32>
      %62 = math.exp %61 : vector<4x16xf32>
      %cst_28 = arith.constant 0.000000e+00 : f32
      %63 = vector.broadcast %cst_28 : f32 to vector<4x16xf32>
      %64 = arith.select %59, %63, %62 : vector<4x16xi1>, vector<4x16xf32>
      %cst_29 = arith.constant dense<0.000000e+00> : vector<16xf32>
      %65 = vector.multi_reduction <add>, %64, %cst_29 [0] : vector<4x16xf32> to vector<16xf32>
      %66 = vector.shape_cast %65 : vector<16xf32> to vector<1x16xf32>
      %cst_30 = arith.constant 9.99999993E-9 : f32
      %67 = vector.broadcast %cst_30 : f32 to vector<1x16xf32>
      %68 = arith.addf %66, %67 : vector<1x16xf32>
      %69 = arith.divf %54, %68 : vector<1x16xf32>
      %cst_31 = arith.constant 9.99999993E-9 : f32
      %70 = vector.broadcast %cst_31 : f32 to vector<1x16xf32>
      %71 = arith.addf %69, %70 : vector<1x16xf32>
      %72 = math.log %71 : vector<1x16xf32>
      %cst_32 = arith.constant 0.000000e+00 : f32
      %73 = vector.broadcast %cst_32 : f32 to vector<1x16xf32>
      %74 = arith.subf %73, %72 : vector<1x16xf32>
      %cst_33 = arith.constant 0.000000e+00 : f32
      %75 = vector.broadcast %cst_33 : f32 to vector<1x16xf32>
      %76 = arith.maximumf %74, %75 : vector<1x16xf32>
      %c0_34 = arith.constant 0 : index
      %c0_35 = arith.constant 0 : index
      %77 = vector.load %arg6[%c0_34, %c0_35] : memref<1x16xf32, #tpu.memory_space<vmem>>, vector<1x16xf32>
      tpu.vector_store %arg6[%c0_34, %c0_35], %76 {strides = array<i32>} : memref<1x16xf32, #tpu.memory_space<vmem>>, vector<1x16xf32>,
      %c1 = arith.constant 1 : index
      %78 = memref.load %arg10[%c1] : memref<2xf32, #tpu.memory_space<smem>>
      %79 = vector.shape_cast %76 : vector<1x16xf32> to vector<1x1x16xf32>
      %cst_36 = arith.constant dense<0.000000e+00> : vector<1xf32>
      %80 = vector.multi_reduction <add>, %79, %cst_36 [1, 2] : vector<1x1x16xf32> to vector<1xf32>
      %81 = vector.shape_cast %80 : vector<1xf32> to vector<1x1x1xf32>
      %82 = vector.extract %81[0, 0, 0] : f32 from vector<1x1x1xf32>
      %83 = arith.addf %78, %82 : f32
      %c1_37 = arith.constant 1 : index
      %84 = memref.load %arg10[%c1_37] : memref<2xf32, #tpu.memory_space<smem>>
      memref.store %83, %arg10[%c1_37] : memref<2xf32, #tpu.memory_space<smem>>
      %c0_i32_38 = arith.constant 0 : i32
      %85 = arith.cmpi eq, %arg1, %c0_i32_38 : i32
      %86 = arith.extui %85 : i1 to i32
      %c0_i32_39 = arith.constant 0 : i32
      %87 = arith.cmpi ne, %86, %c0_i32_39 : i32
      scf.if %87 {
        %c1_40 = arith.constant 1 : index
        %88 = memref.load %arg10[%c1_40] : memref<2xf32, #tpu.memory_space<smem>>
        %cst_41 = arith.constant 6.250000e-02 : f32
        %89 = arith.mulf %88, %cst_41 : f32
        %c0_42 = arith.constant 0 : index
        %90 = memref.load %arg5[%c0_42] : memref<1xf32, #tpu.memory_space<smem>>
        memref.store %89, %arg5[%c0_42] : memref<1xf32, #tpu.memory_space<smem>>
      } else {
      }
    } else {
    }
    return
  }
  func.func @transform_0(%arg0: i32, %arg1: i32) -> (i32, i32) {
    %c0_i32 = arith.constant 0 : i32
    %c0_i32_0 = arith.constant 0 : i32
    return %arg1, %c0_i32 : i32, i32
  }
  func.func @transform_1(%arg0: i32, %arg1: i32) -> (i32, i32) {
    %0 = arith.muli %arg1, %arg0 : i32
    %c0_i32 = arith.constant 0 : i32
    %c0_i32_0 = arith.constant 0 : i32
    return %c0_i32, %0 : i32, i32
  }
  func.func @transform_2(%arg0: i32, %arg1: i32) -> (i32, i32) {
    %c0_i32 = arith.constant 0 : i32
    %c0_i32_0 = arith.constant 0 : i32
    %c0_i32_1 = arith.constant 0 : i32
    return %c0_i32, %c0_i32_0 : i32, i32
  }
  func.func @transform_3(%arg0: i32, %arg1: i32) -> i32 {
    %c0_i32 = arith.constant 0 : i32
    %c0_i32_0 = arith.constant 0 : i32
    return %c0_i32 : i32
  }
  func.func @transform_4(%arg0: i32, %arg1: i32) -> (i32, i32) {
    %0 = arith.muli %arg1, %arg0 : i32
    %c0_i32 = arith.constant 0 : i32
    %c0_i32_0 = arith.constant 0 : i32
    return %c0_i32, %0 : i32, i32
  }
}

</mosaic_0001>

<bundles_post_ra>
// kernel: tpu_custom_call.1
= control target key start
LH: loop header
LB: loop body
LE: loop exit
PB: predicated region body
PF: predicated region fallthrough
CT: control target
= control target key end

     0   :  { %10 = vsyncpa [#allocation7], 0  ;;  %s1147_s0 = inlined_call_operand.hbm [shape: f32[16,32], index: 0, kind: input, shape index: {}]   ;;  %s1148_s1 = inlined_call_operand.vmem [shape: s32[1,16], index: 1, kind: input, shape index: {}]   ;;  %s1149_s2 = inlined_call_operand.vmem [shape: s32[4,1], index: 2, kind: input, shape index: {}]   ;;  %s1150_s3 = inlined_call_operand.hbm [shape: f32[1], index: 3, kind: output, shape index: {0}]   ;;  %s1151_s4 = inlined_call_operand.hbm [shape: f32[1,16], index: 4, kind: output, shape index: {1}]  }
   0x1   :  { %11 = vsyncpa [#allocation9], 0 }
   0x2   :  { %12 = vsyncpa [#allocation8], 0 }
   0x3   :  { %14 = vsyncpa [#allocation8 + $0x1], 0  ;;  %s1054_s15 = smov 0   ;;  %s1056_s16 = smov 0  }
   0x4   :  { %s1058_s17 = smov 0  }
   0x5 LB: > { %s775_s18 = sadd.s32 4294967295, %s1014_s17   ;;  %s776_s19 = sadd.s32 4294967294, %s1014_s17   ;;  %s1014_s17 = sphi %s1058_s17, %s20_s17   ;;  %s1010_s16 = sphi %s1056_s16, %s1156_s16   ;;  %s1006_s15 = sphi %s1054_s15, %s1155_s15  }
   0x6   : > { %s32_s20 = sadd.s32 1, %s1010_s16  ;;  %p777_p0 = scmp.ge.s32.totalorder %s1014_s17, 1 }
   0x7   : > { %p34_p1 = scmp.ge.s32.totalorder %s32_s20, 2  ;;  %p161_p2 = scmp.lt.s32.totalorder %s1014_s17, 3 }
   0x8   : > { %p1076_p3 = scmp.eq.s32.totalorder %s775_s18, 0  ;;  %s1016_s23 = smov [#allocation6]  }
   0x9   : > { %s1158_s20 = smov (%p34_p1, %s32_s20), 0  ;;  %p1082_p4 = pnand %p777_p0, %p161_p2 }
   0xa   : > { %s176_s24 = sshll.u32 %s1016_s23, 4  ;;  %s177_s24 = int_to_ptr.vmem [resolvable:$true] %s176_s24 }
   0xb   : > { %p856_p5 = pneg %p1082_p4  ;;  %s931_s25 = scalar_lea.vmem %s177_s24, 256 }
   0xc   : > { %p932_p8 = scmp.ne.s32.totalorder %s177_s24, %s931_s25  ;;  %p939_p11 = scmp.lt.s32.totalorder %s177_s24, %s177_s24 }
   0xd   : > { %p857_p6 = pnand %p1076_p3, %p856_p5  ;;  %p940_p12 = scmp.lt.s32.totalorder %s931_s25, %s931_s25 }
   0xf   : > { %p922_p7 = pneg %p857_p6  ;;  %p941_p13 = por %p940_p12, %p939_p11 }
  0x11   : > { %p934_p9 = pnand %p932_p8, %p922_p7 }
  0x13   : > { %p935_p10 = pneg %p934_p9 }
  0x15   : > { %p942_p0 = pnand %p941_p13, %p935_p10 }
  0x17   : > { %945 = shalt.err (!%p942_p0)
}
  0x18   : > { %s1017_s26 = smov 128   ;;  %s1018_s27 = smov 8  }
  0x19   : > { %859 = dma.hbm_to_vmem [thread:$0]  (!%p857_p6), %s1147_s0, 256, %s177_s24, [#allocation7], %s1017_s26, %s1017_s26, %s1018_s27  }
  0x1a   : > { %203 = sbr.rel (%p1082_p4) target bundleno = 1186 (0x4a2), region = 32 }
  0x1f   : > { %993 = dma.done.wait (%p1076_p3), [#allocation7], 256  }
  0x20   : > { %995 = vsyncadd (%p1076_p3), [#allocation7], 4294967040  ;;  %p234_p1 = scmp.eq.s32.totalorder %s1006_s15, 0 }
  0x21   : > { %vm240_vm0 = vcmask (%p234_p1), 257024   ;;  %vm242_vm1 = vcmask (%p234_p1), 122880   ;;  %v1019_v0 = vmov (%p234_p1), 0.0   ;;  %s1020_s30 = smov (%p234_p1), 0.0  }
  0x22   : > { %239 = sbr.rel (!%p234_p1) target bundleno = 39 (0x27), region = 40  ;;  %241 = vst.msk [vmem:[#allocation2] sm:$0xf] (%p234_p1), %vm240_vm0, %v1019_v0  ;;  %245 = sst [smem:[#allocation5]] (%p234_p1), %s1020_s30 }
  0x23   : > { %243 = vst.msk [vmem:[#allocation11] sm:$0x1] (%p234_p1), %vm242_vm1, %v1019_v0  ;;  %247 = sst [smem:[#allocation5 + $0x1]] (%p234_p1), %s1020_s30 }
  0x27 PF: > { %p784_p2 = scmp.ne.s32.totalorder %s1006_s15, 0 }
  0x28   : > { %s431_s5 = sld [smem:[#allocation5]] (!%p784_p2) }
  0x29   : > { %250 = sbr.rel (%p784_p2) target bundleno = 453 (0x1c5), region = 44 }
  0x2e   : > { %v252_v1 = vld [vmem:[#allocation6 + $0x8] sm:$0xff]  ;;  %vm255_vm2 = vcmask 261120   ;;  %v251_v2 = vld [vmem:[#allocation6] sm:$0xff]  ;;  %v1021_v3 = vmov 0.0   ;;  %vm1022_vm3 = vmmov 0   ;;  %v1023_v6 = vmov 1.0  }
  0x2f   : > { %815 = vmatprep.subr.mxu0 %v1021_v3  ;;  %v254_v4 = vmul.f32 %v252_v1, %v252_v1  ;;  %819 = vmatprep.mubr.msk.f32.mxu0 %vm1022_vm3, %v1021_v3  ;;  %v253_v5 = vmul.f32 %v251_v2, %v251_v2  ;;  %v339_v7 = vlaneseq  ;;  %vm353_vm6 = vcmask 130048   ;;  %v352_v16 = vld [vmem:[#allocation2] sm:$0xf] }
  0x30   : > { %822 = vmatprep.subr.mxu1 %v1021_v3  ;;  %826 = vmatprep.mubr.msk.f32.mxu1 %vm1022_vm3, %v1021_v3  ;;  %vm336_vm8 = vcmask 122880   ;;  %vm429_vm9 = vcmask 257024  }
  0x31   : > { %816 = vmatpush3.xpose.msk.msra.mxu0 %vm255_vm2, %v254_v4  ;;  %823 = vmatpush3.msra.mxu1 %v252_v1  ;;  %v344_v8 = vshrl.u32 %v339_v7, 7  ;;  %v340_v10 = vand.u32 127, %v339_v7 }
  0x32   : > { %817 = vmatprep.subr.mxu0 %v1021_v3  ;;  %824 = vmatprep.subr.mxu1 %v1021_v3 }
  0x33   : > { %825 = vmatpush3.msra.mxu1 %v251_v2  ;;  %v345_v9 = vmul.u32 4, %v344_v8 }
  0x35   : > { %818 = vmatpush3.xpose.msk.msra.mxu0 %vm255_vm2, %v253_v5  ;;  %v347_v11 = vadd.s32 4, %v345_v9  ;;  %vm346_vm4 = vcmp.ge.s32.totalorder %v340_v10, %v345_v9 }
  0x37   : > { %vm348_vm5 = vcmp.lt.s32.totalorder %v340_v10, %v347_v11 }
  0x38   : > { %820 = vmatmul.mubr.msk.f32.vlgmr.msra.gmra.mxu0 %vm255_vm2, %v1023_v6  ;;  %vm349_vm7 = vmand %vm346_vm4, %vm348_vm5 }
  0x39   : > { %v788_v12 = vsel %vm349_vm7, 1.0, %v1021_v3 }
  0x3a   : > { %827 = vmatmul.mubr.msk.f32.vlgmr.msra.gmra.mxu1 %vm353_vm6, %v788_v12 }
  0xf8   : > { %v331_v13 = vpop.f32.mrf.mxu0 }
  0xf9   : > { %337 = vst.msk [vmem:[#allocation4] sm:$0x1] %vm336_vm8, %v331_v13  ;;  %v432_v14 = vsel %vm336_vm8, %v331_v13, 0.0 }
  0xfa   : > { %v821_v15 = vpop.f32.mrf.mxu0  ;;  %433 = vadd.xlane.f32.xlu0 %v432_v14  ;;  %v423_v17 = vpop.f32.mrf.mxu1 }
  0xfb   : > { %v427_v18 = vmul.f32 0.25, %v423_v17 }
  0xfc   : > { %v828_v19 = vpop.f32.mrf.mxu1 }
  0xfd   : > { %v428_v20 = vadd.f32 %v427_v18, %v352_v16 }
  0xff   : > { %430 = vst.msk [vmem:[#allocation2] sm:$0xf] %vm429_vm9, %v428_v20 }
 0x183   : > { %v434_v21 = vpop.xlane.xlu0 %433 }
 0x184   : > { %v435_v22 = vrot.slane %v434_v21, 4 }
 0x186   : > { %v436_v23 = vadd.f32 %v435_v22, %v434_v21 }
 0x188   : > { %v437_v24 = vrot.slane %v436_v23, 2 }
 0x18a   : > { %v438_v25 = vadd.f32 %v437_v24, %v436_v23 }
 0x18c   : > { %v439_v26 = vrot.slane %v438_v25, 1 }
 0x18e   : > { %v440_v27 = vadd.f32 %v439_v26, %v438_v25 }
 0x190   : > { %836 = vpush %v440_v27 }
 0x1c1   : > { %s837_s6 = spop %836 }
 0x1c2   : > { %s442_s7 = sadd.f32 %s837_s6, %s431_s5 }
 0x1c4   : > { %444 = sst [smem:[#allocation5]] %s442_s7 }
 0x1c5 PF: > { %p790_p3 = scmp.ne.s32.totalorder %s1006_s15, 1 }
 0x1c6   : > { %s460_s10 = sld [smem:[#allocation5]] (!%p790_p3) }
 0x1c7   : > { %448 = sbr.rel (%p790_p3) target bundleno = 1168 (0x490), region = 48  ;;  %s797_s26 = sld [smem:[#allocation5 + $0x1]] (!%p790_p3) }
 0x1cc   : > { %v449_v28 = vld [vmem:[#allocation2] sm:$0xf]  ;;  %vm454_vm10 = vcmask 257024   ;;  %v477_v29 = vld [vmem:[#allocation6 + $0x8] sm:$0xff]  ;;  %vm478_vm11 = vcmask 261120   ;;  %v1024_v31 = vmov 0.0   ;;  %v585_v51 = vlaneseq }
 0x1cd   : > { %v453_v30 = vmul.f32 %v449_v28, %v449_v28  ;;  %829 = vmatprep.subr.mxu0 %v1024_v31  ;;  %vm1025_vm12 = vmmov 0   ;;  %v476_v33 = vld [vmem:[#allocation6] sm:$0xff]  ;;  %v1026_v34 = vmov 0   ;;  %vm458_vm13 = vcmask 3072   ;;  %v611_v39 = vld [vmem:[%s1149_s2] sm:$0xf] }
 0x1ce   : > { %830 = vmatpush3.xpose.msk.msra.mxu0 %vm478_vm11, %v477_v29  ;;  %833 = vmatprep.mubr.msk.f32.mxu0 %vm1025_vm12, %v1024_v31  ;;  %v590_v52 = vshrl.u32 %v585_v51, 7  ;;  %v794_v53 = vld [vmem:[#allocation4] ss:$0 sm:$0xff]  ;;  %v586_v58 = vand.u32 127, %v585_v51  ;;  %vm597_vm1 = vcmask 125952   ;;  %vm639_vm3 = vcmask 122880  }
 0x1cf   : > { %v455_v32 = vsel %vm454_vm10, %v453_v30, 0.0  ;;  %831 = vmatprep.subr.mxu0 %v1024_v31  ;;  %908 = vset.pattern.permute.xlu1 %v1026_v34  ;;  %v796_v7 = vld [vmem:[%s1148_s1] ss:$0 sm:$0xff] }
 0x1d0   : > { %456 = vadd.xlane.f32.xlu0 %v455_v32  ;;  %v591_v55 = vmul.u32 4, %v590_v52 }
 0x1d1   : > { %909 = vset.pattern.permute.xlu0 %v1026_v34 }
 0x1d2   : > { %832 = vmatpush3.xpose.msk.msra.mxu0 %vm478_vm11, %v476_v33  ;;  %v593_v59 = vadd.s32 4, %v591_v55  ;;  %vm592_vm14 = vcmp.ge.s32.totalorder %v586_v58, %v591_v55 }
 0x1d4   : > { %vm594_vm15 = vcmp.lt.s32.totalorder %v586_v58, %v593_v59 }
 0x1d5   : > { %834 = vmatmul.mubr.msk.f32.vlgmr.msra.gmra.mxu0 %vm478_vm11, %v449_v28  ;;  %vm595_vm0 = vmand %vm592_vm14, %vm594_vm15 }
 0x259   : > { %v457_v35 = vpop.xlane.xlu0 %456 }
 0x25a   : > { %459 = vst.msk [vmem:[#allocation3] sm:$0xf] %vm458_vm13, %v457_v35 }
 0x261   : > { %v560_v36 = vld [vmem:[#allocation3] sm:$0xf] }
 0x262   : > { %v461_v37 = vld [vmem:[#allocation3] sm:$0xf]  ;;  %563 = vperm.xlu1 %908, %v560_v36  }
 0x263   : > { %v462_v38 = vsel %vm458_vm13, %v461_v37, 0.0 }
 0x264   : > { %463 = vadd.xlane.f32.xlu0 %v462_v38 }
 0x266   : > { %617 = vperm.xlu1 %908, %v611_v39  }
 0x295   : > { %v554_v40 = vpop.f32.mrf.mxu0 }
 0x296   : > { %v573_v56 = vmul.f32 2.0, %v554_v40 }
 0x297   : > { %v835_v41 = vpop.f32.mrf.mxu0 }
 0x2dd   : > { %v564_v54 = vpop.permute.xlu1 %563 }
 0x2de   : > { %v572_v57 = vadd.f32 %v794_v53, %v564_v54 }
 0x2e0   : > { %v574_v60 = vsub.f32 %v572_v57, %v573_v56 }
 0x2e1   : > { %v618_v8 = vpop.permute.xlu1 %617 }
 0x2e2   : > { %v575_v61 = vmax.f32 %v574_v60, 0.0  ;;  %vm619_vm2 = vcmp.eq.s32.totalorder %v796_v7, %v618_v8 }
 0x2e4   : > { %v596_v62 = vsel %vm595_vm0, %v575_v61, 0.0 }
 0x2e5   : > { %v598_v63 = vsel %vm597_vm1, %v596_v62, 0.0 }
 0x2e6   : > { %v599_v0 = vrot.slane %v598_v63, 4 }
 0x2e8   : > { %v600_v4 = vadd.f32 %v599_v0, %v598_v63 }
 0x2ea   : > { %v601_v5 = vrot.slane %v600_v4, 2 }
 0x2ec   : > { %v602_v6 = vadd.f32 %v601_v5, %v600_v4 }
 0x2ed   : > { %v464_v42 = vpop.xlane.xlu0 %463 }
 0x2ee   : > { %v465_v43 = vrot.slane %v464_v42, 4  ;;  %v603_v9 = vrot.slane %v602_v6, 1 }
 0x2f0   : > { %v466_v44 = vadd.f32 %v465_v43, %v464_v42  ;;  %v604_v12 = vadd.f32 %v603_v9, %v602_v6 }
 0x2f2   : > { %v467_v45 = vrot.slane %v466_v44, 2 }
 0x2f4   : > { %v468_v46 = vadd.f32 %v467_v45, %v466_v44 }
 0x2f6   : > { %v469_v47 = vrot.slane %v468_v46, 1 }
 0x2f8   : > { %v470_v48 = vadd.f32 %v469_v47, %v468_v46 }
 0x2fa   : > { %838 = vpush %v470_v48 }
 0x32b   : > { %s839_s11 = spop %838 }
 0x32c   : > { %s472_s12 = smul.f32 4.0, %s839_s11 }
 0x32e   : > { %s473_s13 = ssub.f32 %s460_s10, %s472_s12 }
 0x330   : > { %475 = sst [smem:[#allocation5]] %s473_s13  ;;  %s577_s14 = smul.f32 0.06666667, %s473_s13 }
 0x332   : > { %s578_s15 = smul.f32 2.0, %s577_s14 }
 0x334   : > { %s579_s21 = smul.f32 %s578_s15, %s577_s14 }
 0x336   : > { %v580_v49 = vstv %s579_s21 }
 0x337   : > { %910 = vrcp.f32 %v580_v49 }
 0x344   : > { %v911_v50 = vpop.eup %910 }
 0x345   : > { %840 = vpush %v911_v50 }
 0x376   : > { %s841_s22 = spop %840 }
 0x377   : > { %s583_s23 = smul.f32 -1.0, %s841_s22 }
 0x379   : > { %v605_v1 = vstv %s583_s23 }
 0x37a   : > { %v620_v2 = vmul.f32 %v605_v1, %v575_v61  ;;  %v606_v15 = vmul.f32 %v605_v1, %v604_v12 }
 0x37c   : > { %v621_v3 = vmul.f32 1.442695, %v620_v2  ;;  %v795_v18 = vadd.f32 -1.0, %v606_v15 }
 0x37e   : > { %912 = vpow2.f32 %v621_v3  ;;  %v608_v21 = vmul.f32 1.442695, %v795_v18 }
 0x380   : > { %914 = vpow2.f32 %v608_v21 }
 0x38b   : > { %v913_v10 = vpop.eup %912 }
 0x38c   : > { %v623_v11 = vsel %vm619_vm2, 0.0, %v913_v10 }
 0x38d   : > { %v624_v13 = vsel %vm597_vm1, %v623_v11, 0.0  ;;  %v915_v24 = vpop.eup %914 }
 0x38e   : > { %v625_v14 = vrot.slane %v624_v13, 4 }
 0x390   : > { %v626_v16 = vadd.f32 %v625_v14, %v624_v13 }
 0x392   : > { %v627_v17 = vrot.slane %v626_v16, 2 }
 0x394   : > { %v628_v19 = vadd.f32 %v627_v17, %v626_v16 }
 0x396   : > { %v629_v20 = vrot.slane %v628_v19, 1 }
 0x398   : > { %v630_v22 = vadd.f32 %v629_v20, %v628_v19 }
 0x39a   : > { %v631_v23 = vadd.f32 1e-08, %v630_v22 }
 0x39c   : > { %916 = vrcp.f32 %v631_v23 }
 0x3a9   : > { %v917_v25 = vpop.eup %916 }
 0x3aa   : > { %v633_v26 = vmul.f32 %v917_v25, %v915_v24 }
 0x3ac   : > { %v634_v27 = vadd.f32 1e-08, %v633_v26 }
 0x3ae   : > { %918 = vlog2.f32 %v634_v27 }
 0x3bb   : > { %v919_v28 = vpop.eup %918 }
 0x3bc   : > { %v636_v29 = vmul.f32 0.6931472, %v919_v28 }
 0x3be   : > { %v637_v30 = vsub.f32 0.0, %v636_v29 }
 0x3c0   : > { %v638_v31 = vmax.f32 %v637_v30, 0.0 }
 0x3c2   : > { %v642_v32 = vsel %vm639_vm3, %v638_v31, 0.0  ;;  %640 = vst.msk [vmem:[#allocation11] sm:$0x1] %vm639_vm3, %v638_v31 }
 0x3c3   : > { %643 = vadd.xlane.f32.xlu0 %v642_v32 }
 0x44c   : > { %v644_v33 = vpop.xlane.xlu0 %643 }
 0x44d   : > { %v645_v34 = vrot.slane %v644_v33, 4 }
 0x44f   : > { %v646_v35 = vadd.f32 %v645_v34, %v644_v33 }
 0x451   : > { %v647_v36 = vrot.slane %v646_v35, 2 }
 0x453   : > { %v648_v37 = vadd.f32 %v647_v36, %v646_v35 }
 0x455   : > { %v649_v38 = vrot.slane %v648_v37, 1 }
 0x457   : > { %v650_v39 = vadd.f32 %v649_v38, %v648_v37 }
 0x459   : > { %842 = vpush %v650_v39 }
 0x48a   : > { %s843_s27 = spop %842 }
 0x48b   : > { %s652_s28 = sadd.f32 %s843_s27, %s797_s26 }
 0x48d   : > { %654 = sst [smem:[#allocation5 + $0x1]] %s652_s28  ;;  %s659_s29 = smul.f32 0.0625, %s652_s28 }
 0x48f   : > { %661 = sst [smem:[#allocation10]] %s659_s29 }
 0x490 PF: > { %p1115_p4 = scmp.eq.s32.totalorder %s775_s18, 1  ;;  %s1027_s5 = smov [#allocation10]  }
 0x491   : > { %s1028_s8 = smov [#allocation11]  }
 0x492   : > { %849 = dma.smem_to_hbm (%p1115_p4), %s1027_s5, 16, %s1150_s3, [#allocation9]  }
 0x493   : > { %s685_s9 = sshll.u32 %s1028_s8, 4  ;;  %s686_s9 = int_to_ptr.vmem [resolvable:$true] %s685_s9 }
 0x494   : > { %s956_s10 = scalar_lea.vmem %s686_s9, 16  ;;  %s962_s18 = scalar_lea.vmem %s686_s9, 32 }
 0x495   : > { %p957_p5 = scmp.ne.s32.totalorder %s686_s9, %s956_s10  ;;  %p963_p8 = scmp.lt.s32.totalorder %s686_s9, %s686_s9 }
 0x496   : > { %p964_p9 = scmp.lt.s32.totalorder %s962_s18, %s956_s10 }
 0x497   : > { %p958_p6 = pnand %p957_p5, %p1115_p4 }
 0x498   : > { %p965_p10 = por %p964_p9, %p963_p8 }
 0x499   : > { %p959_p7 = pneg %p958_p6 }
 0x49b   : > { %p966_p11 = pnand %p965_p10, %p959_p7 }
 0x49d   : > { %969 = shalt.err (!%p966_p11)
}
 0x49e   : > { %851 = dma.vmem_to_hbm [thread:$0]  (%p1115_p4), %s686_s9, 16, %s1151_s4, [#allocation8]  }
 0x49f   : > { %997 = dma.done.wait (%p1115_p4), [#allocation9], 16  }
 0x4a0   : > { %999 = vsyncadd (%p1115_p4), [#allocation9], 4294967280 }
 0x4a1   : > { %693 = sfence }
 0x4a2 PF: > { %p869_p12 = scmp.ge.s32.totalorder %s1014_s17, 2  ;;  %p870_p13 = scmp.eq.s32.totalorder %s776_s19, 1 }
 0x4a4   : > { %p861_p0 = pnand %p870_p13, %p869_p12 }
 0x4a6   : > { %p862_p1 = pneg %p861_p0 }
 0x4a8   : > { %1001 = dma.done.wait (%p862_p1), [#allocation8], 16  }
 0x4a9   : > { %1003 = vsyncadd (%p862_p1), [#allocation8], 4294967280  ;;  %s20_s17 = sadd.s32 1, %s1014_s17   ;;  %s1155_s15 = smov %s1010_s16 }
 0x4aa   : > { %p17_p2 = scmp.ge.s32.totalorder %s20_s17, 4   ;;  %s1156_s16 = smov %s1158_s20 }
 0x4ac   :  { %19 = sbr.rel (!%p17_p2) target bundleno = 5 (0x5), region = 110 }
 0x4b1   :  { %707 = vsyncpa [#allocation7], 1 }
 0x4b2   :  { %709 = vsyncpa [#allocation7 + $0x1], 1 }
 0x4b3   :  { %710 = vsyncpa [#allocation8], 1 }
 0x4b4   :  { %712 = vsyncpa [#allocation8 + $0x1], 1 }
 0x4b5   :  { %713 = vsyncpa [#allocation9], 1 }
 0x4b6   :  { %715 = vsyncpa [#allocation9 + $0x1], 1 }

</bundles_post_ra>
